<compile_context>
chip_gen: v5e
topology: v5e:2x2
jax: 0.10.0
libtpu: 0.0.40
codegen_flags: <defaults>
</compile_context>

<pallas_src>
import functools

import jax
import jax.numpy as jnp
from jax.experimental import pallas as pl
from jax.experimental.pallas import tpu as pltpu

_BN_EPS = 1e-5


def _rup(n, m):
    return ((n + m - 1) // m) * m


def _halo_geometry(h, w):
    """Flat halo-scratch geometry for the 3x3 conv.

    The (h+2, w+2) zero-padded image is flattened into rows of a 2-D scratch;
    padded pixel (r, c) sits at flat row  base + r*(w+2) + c.  `base` aligns the
    big per-image interior store to a sublane (8) boundary; `rows` also covers
    the deepest tap over-read (offset 2*(w+2)+2 past the last output row).
    """
    wp2 = w + 2
    base = (-wp2) % 8
    rows = _rup(base + (h + 2) * wp2 + 2, 8)
    return base, rows


def _stats_rows(y):
    """(sum, sumsq) over the pixel axis of a (P, C) f32 value -> (2, C)."""
    s = jnp.sum(y, axis=0, keepdims=True)
    sq = jnp.sum(y * y, axis=0, keepdims=True)
    return jnp.concatenate([s, sq], axis=0)


# ----------------------------- stage kernels --------------------------------

def _stage1_kernel(has_proj, x_ref, w1_ref, b1_ref, *rest):
    """y1 = conv1(relu(x)); optional 1x1 residual projection(x); BN1 stats."""
    if has_proj:
        wp_ref, bp_ref, y1_ref, s1_ref, res_ref = rest
    else:
        y1_ref, s1_ref = rest
    bt, h, w, cin = x_ref.shape
    cm = w1_ref.shape[1]
    p = bt * h * w

    x2 = x_ref[...].reshape(p, cin)                          # f32 input
    a = jnp.maximum(x2, 0.0)                                 # relu1(x)
    y1 = jnp.dot(a.astype(w1_ref.dtype), w1_ref[...],
                 preferred_element_type=jnp.float32) + b1_ref[...]
    y1_ref[...] = y1.reshape(bt, h, w, cm).astype(y1_ref.dtype)
    s1_ref[0] = _stats_rows(y1)                              # f32 stats pre-cast

    if has_proj:
        co = wp_ref.shape[1]
        r = jnp.dot(x2.astype(wp_ref.dtype), wp_ref[...],    # projection on raw x
                    preferred_element_type=jnp.float32) + bp_ref[...]
        res_ref[...] = r.reshape(bt, h, w, co).astype(res_ref.dtype)


def _stage2_kernel(y1_ref, sc1_ref, sh1_ref, w2_ref, b2_ref,
                   y2_ref, s2_ref, pad_ref):
    """t = relu(bn1(y1)); y2 = 3x3 conv(t) via a flat halo scratch; BN2 stats."""
    bt, h, w, cm = y1_ref.shape
    wp2 = w + 2
    m2 = h * wp2                                   # width-padded output rows
    base, padrows = _halo_geometry(h, w)
    assert padrows == pad_ref.shape[0]

    # BN1 apply + ReLU for the whole batch tile in f32, then one cast for MXU.
    t = y1_ref[...].reshape(bt * h * w, cm).astype(jnp.float32)
    t = jnp.maximum(t * sc1_ref[...] + sh1_ref[...], 0.0)
    th = t.astype(pad_ref.dtype).reshape(bt, h, w, cm)

    # Re-zero only the constant borders (top pad rows, bottom pad rows + tap
    # over-read tail) — ~2*(w+2) rows instead of the whole scratch each step.
    top = base + wp2
    pad_ref[pl.ds(0, top), :] = jnp.zeros((top, cm), pad_ref.dtype)
    bot = base + (h + 1) * wp2
    pad_ref[pl.ds(bot, padrows - bot), :] = jnp.zeros((padrows - bot, cm),
                                                      pad_ref.dtype)

    zcol = jnp.zeros((h, 1, cm), pad_ref.dtype)    # hoisted, reused per image
    s_acc = jnp.zeros((1, cm), jnp.float32)
    q_acc = jnp.zeros((1, cm), jnp.float32)
    for b in range(bt):                            # static per-image halo loop
        # One aligned store of the width-padded image rows (borders = zeros).
        tp = jnp.concatenate([zcol, th[b], zcol], axis=1)      # (h, w+2, cm)
        pad_ref[pl.ds(top, m2), :] = tp.reshape(m2, cm)
        # 9 contiguous leading-axis taps -> back-to-back accumulating MXU dots.
        acc = jnp.zeros((m2, cm), jnp.float32)
        for ky in range(3):
            for kx in range(3):
                tap = pad_ref[pl.ds(base + ky * wp2 + kx, m2), :]
                acc = acc + jnp.dot(tap, w2_ref[ky * 3 + kx],
                                    preferred_element_type=jnp.float32)
        # Drop the 2 garbage columns of the width-padded domain, add bias once.
        yb = acc.reshape(h, wp2, cm)[:, :w, :] + b2_ref[...]
        y2_ref[b] = yb.astype(y2_ref.dtype)
        yf = yb.reshape(h * w, cm)
        s_acc = s_acc + jnp.sum(yf, axis=0, keepdims=True)
        q_acc = q_acc + jnp.sum(yf * yf, axis=0, keepdims=True)
    s2_ref[0] = jnp.concatenate([s_acc, q_acc], axis=0)


def _stage3_kernel(y2_ref, sc2_ref, sh2_ref, w3_ref, b3_ref, y3_ref, s3_ref):
    """y3 = conv3(bn2(y2))  (no relu between bn2 and conv3); BN3 stats."""
    bt, h, w, cm = y2_ref.shape
    co = w3_ref.shape[1]
    p = bt * h * w
    t = y2_ref[...].reshape(p, cm).astype(jnp.float32) * sc2_ref[...] + sh2_ref[...]
    y3 = jnp.dot(t.astype(w3_ref.dtype), w3_ref[...],
                 preferred_element_type=jnp.float32) + b3_ref[...]
    y3_ref[...] = y3.reshape(bt, h, w, co).astype(y3_ref.dtype)
    s3_ref[0] = _stats_rows(y3)


def _stage4_kernel(y3_ref, sc3_ref, sh3_ref, res_ref, o_ref):
    """out = relu(bn3(y3) + residual)."""
    bt, h, w, c = y3_ref.shape
    p = bt * h * w
    t = y3_ref[...].reshape(p, c).astype(jnp.float32) * sc3_ref[...] + sh3_ref[...]
    r = res_ref[...].reshape(p, c).astype(jnp.float32)
    o_ref[...] = jnp.maximum(t + r, 0.0).reshape(bt, h, w, c)


# ------------------------------- wrapper -------------------------------------

def _bn_fold(stats, gamma_row, beta_row, count):
    """stats: (steps, 2, C) per-step (sum, sumsq) -> (scale, shift) rows (1, C)."""
    # TODO(synk): single-pass E[x^2]-E[x]^2 can cancel for very large activations;
    # switch to a shifted/Welford reduction if that regime shows up.
    s = jnp.sum(stats[:, 0, :], axis=0, keepdims=True)
    sq = jnp.sum(stats[:, 1, :], axis=0, keepdims=True)
    mean = s / count
    var = jnp.maximum(sq / count - mean * mean, 0.0)
    scale = gamma_row * jax.lax.rsqrt(var + _BN_EPS)
    shift = beta_row - mean * scale
    return scale, shift


def _pick_batch_tile(n, h, w, cmax):
    """Images per grid step: raise the MXU M dim and amortize per-step overhead,
    keep per-step activation blocks modest for double-buffered VMEM, and keep
    >= 2 grid steps so the "parallel" batch axis feeds both TensorCores."""
    cap = max(1, n // 2)
    best = 1
    for bt in range(1, cap + 1):
        if n % bt:
            continue
        if bt * h * w * cmax * 4 > (6 << 20):
            break
        best = bt
        if bt * h * w >= 1024:
            break
    return best


def _vmem_limit_bytes():
    """~80% of physical VMEM: headroom on v7x (64 MiB), big blocks on v5e/v6e."""
    try:
        cap = pltpu.get_tpu_info().vmem_capacity_bytes
    except Exception:
        cap = None
    if not cap:
        return 48 * 1024 * 1024
    return max(32 * 1024 * 1024, min(int(cap * 0.8), 120 * 1024 * 1024))


def bottleneck_forward(x, params, stride=1, mxu_dtype=jnp.bfloat16):
    """x: NHWC float32 -> NHWC float32 (spatial halved when stride == 2)."""
    if stride == 2:
        # 1x1 conv with stride 2 == spatial subsample then 1x1 conv.
        # TODO(synk): fold this subsample into the stage-1 DMA (strided pl.ds)
        # instead of a separate XLA slice in front of the kernel.
        x = x[:, ::2, ::2, :]
    elif stride != 1:
        raise ValueError("stride must be 1 or 2")

    n, h, w, cin = x.shape
    cmid = params["w1"].shape[1]
    cout = params["w3"].shape[1]
    if stride == 1 and cin != cout:
        raise ValueError("identity residual needs in_chans == out_chans")
    f32 = jnp.float32
    act_dtype = mxu_dtype            # bf16 intermediates halve inter-stage HBM traffic

    row = lambda v: v.astype(f32).reshape(1, -1)
    w1 = params["w1"].astype(mxu_dtype)
    w2 = params["w2"].reshape(9, cmid, cmid).astype(mxu_dtype)
    w3 = params["w3"].astype(mxu_dtype)
    b1, b2, b3 = row(params["b1"]), row(params["b2"]), row(params["b3"])
    g1, be1 = row(params["g1"]), row(params["be1"])
    g2, be2 = row(params["g2"]), row(params["be2"])
    g3, be3 = row(params["g3"]), row(params["be3"])

    bt = _pick_batch_tile(n, h, w, max(cin, cmid, cout))
    steps = n // bt
    npix = jnp.float32(n * h * w)

    cp = pltpu.CompilerParams(
        dimension_semantics=("parallel",),          # batch axis -> both TCs
        vmem_limit_bytes=_vmem_limit_bytes())

    img = lambda c: pl.BlockSpec((bt, h, w, c), lambda i: (i, 0, 0, 0))
    full = lambda a: pl.BlockSpec(a.shape, lambda i: (0,) * a.ndim)
    stats_spec = lambda c: pl.BlockSpec((1, 2, c), lambda i: (i, 0, 0))

    # ---- stage 1: conv1 on relu(x) (+ residual projection), BN1 stats -------
    s1_in = [x, w1, b1]
    s1_specs = [img(cin), full(w1), full(b1)]
    s1_shapes = [jax.ShapeDtypeStruct((n, h, w, cmid), act_dtype),
                 jax.ShapeDtypeStruct((steps, 2, cmid), f32)]
    s1_ospecs = [img(cmid), stats_spec(cmid)]
    if stride == 2:
        wp, bp = params["wp"].astype(mxu_dtype), row(params["bp"])
        s1_in += [wp, bp]
        s1_specs += [full(wp), full(bp)]
        s1_shapes.append(jax.ShapeDtypeStruct((n, h, w, cout), act_dtype))
        s1_ospecs.append(img(cout))
    outs = pl.pallas_call(
        functools.partial(_stage1_kernel, stride == 2),
        grid=(steps,), in_specs=s1_specs, out_specs=s1_ospecs,
        out_shape=s1_shapes, compiler_params=cp)(*s1_in)
    if stride == 2:
        y1, st1, res = outs
    else:
        (y1, st1), res = outs, x
    sc1, sh1 = _bn_fold(st1, g1, be1, npix)

    # ---- stage 2: relu(bn1) -> 3x3 conv via flat halo scratch, BN2 stats ----
    _, padrows = _halo_geometry(h, w)
    y2, st2 = pl.pallas_call(
        _stage2_kernel, grid=(steps,),
        in_specs=[img(cmid), full(sc1), full(sh1), full(w2), full(b2)],
        out_specs=[img(cmid), stats_spec(cmid)],
        out_shape=[jax.ShapeDtypeStruct((n, h, w, cmid), act_dtype),
                   jax.ShapeDtypeStruct((steps, 2, cmid), f32)],
        scratch_shapes=[pltpu.VMEM((padrows, cmid), mxu_dtype)],
        compiler_params=cp)(y1, sc1, sh1, w2, b2)
    sc2, sh2 = _bn_fold(st2, g2, be2, npix)

    # ---- stage 3: bn2 -> conv3, BN3 stats ------------------------------------
    y3, st3 = pl.pallas_call(
        _stage3_kernel, grid=(steps,),
        in_specs=[img(cmid), full(sc2), full(sh2), full(w3), full(b3)],
        out_specs=[img(cout), stats_spec(cout)],
        out_shape=[jax.ShapeDtypeStruct((n, h, w, cout), act_dtype),
                   jax.ShapeDtypeStruct((steps, 2, cout), f32)],
        compiler_params=cp)(y2, sc2, sh2, w3, b3)
    sc3, sh3 = _bn_fold(st3, g3, be3, npix)

    # ---- stage 4: bn3 + residual + relu --------------------------------------
    out = pl.pallas_call(
        _stage4_kernel, grid=(steps,),
        in_specs=[img(cout), full(sc3), full(sh3), img(cout)],
        out_specs=img(cout),
        out_shape=jax.ShapeDtypeStruct((n, h, w, cout), f32),
        compiler_params=cp)(y3, sc3, sh3, res)
    return out


# ---------------- pure-JAX reference (verification only) ---------------------

def _conv_ref(x, w_hwio, b, stride, pad):
    y = jax.lax.conv_general_dilated(
        x, w_hwio, (stride, stride), pad,
        dimension_numbers=("NHWC", "HWIO", "NHWC"),
        precision=jax.lax.Precision.HIGHEST)
    return y + b.reshape(1, 1, 1, -1)


def _bn_ref(x, g, b):
    m = jnp.mean(x, axis=(0, 1, 2), keepdims=True)
    v = jnp.mean(jnp.square(x - m), axis=(0, 1, 2), keepdims=True)
    return (x - m) * jax.lax.rsqrt(v + _BN_EPS) * g.reshape(1, 1, 1, -1) + b.reshape(1, 1, 1, -1)


def reference_forward(x, p, stride):
    as1x1 = lambda wm: wm.reshape(1, 1, *wm.shape)
    out = _bn_ref(_conv_ref(jax.nn.relu(x), as1x1(p["w1"]), p["b1"], stride,
                            ((0, 0), (0, 0))), p["g1"], p["be1"])
    out = _bn_ref(_conv_ref(jax.nn.relu(out), p["w2"], p["b2"], 1,
                            ((1, 1), (1, 1))), p["g2"], p["be2"])
    out = _bn_ref(_conv_ref(out, as1x1(p["w3"]), p["b3"], 1,
                            ((0, 0), (0, 0))), p["g3"], p["be3"])
    if stride != 1:
        out = out + _conv_ref(x, as1x1(p["wp"]), p["bp"], stride, ((0, 0), (0, 0)))
    else:
        out = out + x
    return jax.nn.relu(out)


def init_params(key, in_chans, out_chans, stride):
    cmid = in_chans // 2
    ks = jax.random.split(key, 8)
    w = lambda k, shape, fan_in: jax.random.normal(k, shape, jnp.float32) / jnp.sqrt(fan_in)
    p = {
        "w1": w(ks[0], (in_chans, cmid), in_chans),
        "b1": 0.01 * jax.random.normal(ks[1], (cmid,), jnp.float32),
        "w2": w(ks[2], (3, 3, cmid, cmid), 9 * cmid),
        "b2": 0.01 * jax.random.normal(ks[3], (cmid,), jnp.float32),
        "w3": w(ks[4], (cmid, out_chans), cmid),
        "b3": 0.01 * jax.random.normal(ks[5], (out_chans,), jnp.float32),
        # PyTorch BatchNorm2d init: weight=1, bias=0
        "g1": jnp.ones((cmid,), jnp.float32), "be1": jnp.zeros((cmid,), jnp.float32),
        "g2": jnp.ones((cmid,), jnp.float32), "be2": jnp.zeros((cmid,), jnp.float32),
        "g3": jnp.ones((out_chans,), jnp.float32), "be3": jnp.zeros((out_chans,), jnp.float32),
    }
    if stride == 2:
        p["wp"] = w(ks[6], (in_chans, out_chans), in_chans)
        p["bp"] = 0.01 * jax.random.normal(ks[7], (out_chans,), jnp.float32)
    return p


if __name__ == "__main__":
    key = jax.random.PRNGKey(0)
    kx, kp1, kp2 = jax.random.split(key, 3)

    n, hh, ww, cin = 2, 16, 16, 8
    x = jax.random.normal(kx, (n, hh, ww, cin), jnp.float32)

    # Case 1: stride=1 (identity residual), f32 MXU path -> tight check.
    p1 = init_params(kp1, cin, cin, stride=1)
    out1 = jax.block_until_ready(bottleneck_forward(x, p1, stride=1, mxu_dtype=jnp.float32))
    ref1 = reference_forward(x, p1, 1)
    assert out1.shape == (n, hh, ww, cin)
    err1 = float(jnp.max(jnp.abs(out1 - ref1)))
    assert jnp.allclose(out1, ref1, atol=1e-3, rtol=1e-3), err1

    # Case 2: stride=2 with 1x1 projection, f32 MXU path -> tight check.
    cout = 16
    p2 = init_params(kp2, cin, cout, stride=2)
    out2 = jax.block_until_ready(bottleneck_forward(x, p2, stride=2, mxu_dtype=jnp.float32))
    ref2 = reference_forward(x, p2, 2)
    assert out2.shape == (n, hh // 2, ww // 2, cout)
    err2 = float(jnp.max(jnp.abs(out2 - ref2)))
    assert jnp.allclose(out2, ref2, atol=1e-3, rtol=1e-3), err2

    # Case 3: stride=2, default bf16 MXU + bf16 intermediates -> loose check.
    out3 = jax.block_until_ready(bottleneck_forward(x, p2, stride=2, mxu_dtype=jnp.bfloat16))
    err3 = float(jnp.max(jnp.abs(out3 - ref2)))
    assert out3.shape == (n, hh // 2, ww // 2, cout)
    assert jnp.allclose(out3, ref2, atol=2.5e-1, rtol=1.5e-1), err3

    print("KERNEL_OK")
</pallas_src>

<mosaic_0001>
module attributes {stable_mosaic.version = 11 : i64} {
  func.func @_stage1_kernel(%arg0: i32, %arg1: memref<1x16x16x8xf32, #tpu.memory_space<vmem>>, %arg2: memref<8x4xf32, #tpu.memory_space<vmem>>, %arg3: memref<1x4xf32, #tpu.memory_space<vmem>>, %arg4: memref<1x16x16x4xf32, #tpu.memory_space<vmem>>, %arg5: memref<1x2x4xf32, #tpu.memory_space<vmem>>) attributes {dimension_semantics = [#tpu.dimension_semantics<parallel>], iteration_bounds = array<i64: 2>, scalar_prefetch = 0 : i64, scratch_operands = 0 : i64, tpu.core_type = #tpu.core_type<tc>, window_params = [{transform_indices = @transform_0, window_bounds = array<i64: 1, 16, 16, 8>}, {pipeline_mode = #tpu.pipeline_mode<synchronous>, transform_indices = @transform_1, window_bounds = array<i64: 8, 4>}, {pipeline_mode = #tpu.pipeline_mode<synchronous>, transform_indices = @transform_2, window_bounds = array<i64: 1, 4>}, {transform_indices = @transform_3, window_bounds = array<i64: 1, 16, 16, 4>}, {transform_indices = @transform_4, window_bounds = array<i64: 1, 2, 4>}]} {
    %c0 = arith.constant 0 : index
    %c0_0 = arith.constant 0 : index
    %c0_1 = arith.constant 0 : index
    %c0_2 = arith.constant 0 : index
    %0 = vector.load %arg1[%c0, %c0_0, %c0_1, %c0_2] : memref<1x16x16x8xf32, #tpu.memory_space<vmem>>, vector<1x16x16x8xf32>
    %1 = vector.shape_cast %0 : vector<1x16x16x8xf32> to vector<256x8xf32>
    %cst = arith.constant 0.000000e+00 : f32
    %2 = vector.broadcast %cst : f32 to vector<256x8xf32>
    %3 = arith.maximumf %1, %2 : vector<256x8xf32>
    %c0_3 = arith.constant 0 : index
    %c0_4 = arith.constant 0 : index
    %4 = vector.load %arg2[%c0_3, %c0_4] : memref<8x4xf32, #tpu.memory_space<vmem>>, vector<8x4xf32>
    %cst_5 = arith.constant dense<0.000000e+00> : vector<256x4xf32>
    %5 = tpu.matmul %3, %4, %cst_5 {dimension_numbers = #tpu.dot_dimension_numbers<[1], [0], [0], [1], [0, 0, 1, 1], [], []>} : vector<256x8xf32>, vector<8x4xf32>, vector<256x4xf32> -> vector<256x4xf32>
    %c0_6 = arith.constant 0 : index
    %c0_7 = arith.constant 0 : index
    %6 = vector.load %arg3[%c0_6, %c0_7] : memref<1x4xf32, #tpu.memory_space<vmem>>, vector<1x4xf32>
    %7 = vector.broadcast %6 : vector<1x4xf32> to vector<256x4xf32>
    %8 = arith.addf %5, %7 : vector<256x4xf32>
    %9 = vector.shape_cast %8 : vector<256x4xf32> to vector<1x16x16x4xf32>
    %c0_8 = arith.constant 0 : index
    %c0_9 = arith.constant 0 : index
    %c0_10 = arith.constant 0 : index
    %c0_11 = arith.constant 0 : index
    %10 = vector.load %arg4[%c0_8, %c0_9, %c0_10, %c0_11] : memref<1x16x16x4xf32, #tpu.memory_space<vmem>>, vector<1x16x16x4xf32>
    tpu.vector_store %arg4[%c0_8, %c0_9, %c0_10, %c0_11], %9 {strides = array<i32>} : memref<1x16x16x4xf32, #tpu.memory_space<vmem>>, vector<1x16x16x4xf32>,
    %cst_12 = arith.constant dense<0.000000e+00> : vector<4xf32>
    %11 = vector.multi_reduction <add>, %8, %cst_12 [0] : vector<256x4xf32> to vector<4xf32>
    %12 = vector.shape_cast %11 : vector<4xf32> to vector<1x4xf32>
    %13 = arith.mulf %8, %8 : vector<256x4xf32>
    %cst_13 = arith.constant dense<0.000000e+00> : vector<4xf32>
    %14 = vector.multi_reduction <add>, %13, %cst_13 [0] : vector<256x4xf32> to vector<4xf32>
    %15 = vector.shape_cast %14 : vector<4xf32> to vector<1x4xf32>
    %16 = tpu.concatenate %12, %15 in 0 : vector<1x4xf32>, vector<1x4xf32> -> vector<2x4xf32>
    %c0_14 = arith.constant 0 : index
    %c0_15 = arith.constant 0 : index
    %c0_16 = arith.constant 0 : index
    %17 = vector.load %arg5[%c0_14, %c0_15, %c0_16] : memref<1x2x4xf32, #tpu.memory_space<vmem>>, vector<1x2x4xf32>
    %18 = vector.shape_cast %17 : vector<1x2x4xf32> to vector<2x4xf32>
    %19 = vector.shape_cast %16 : vector<2x4xf32> to vector<1x2x4xf32>
    tpu.vector_store %arg5[%c0_14, %c0_15, %c0_16], %19 {strides = array<i32>} : memref<1x2x4xf32, #tpu.memory_space<vmem>>, vector<1x2x4xf32>,
    return
  }
  func.func @transform_0(%arg0: i32) -> (i32, i32, i32, i32) {
    %c0_i32 = arith.constant 0 : i32
    %c0_i32_0 = arith.constant 0 : i32
    %c0_i32_1 = arith.constant 0 : i32
    %c0_i32_2 = arith.constant 0 : i32
    return %arg0, %c0_i32, %c0_i32_0, %c0_i32_1 : i32, i32, i32, i32
  }
  func.func @transform_1(%arg0: i32) -> (i32, i32) {
    %c0_i32 = arith.constant 0 : i32
    %c0_i32_0 = arith.constant 0 : i32
    %c0_i32_1 = arith.constant 0 : i32
    return %c0_i32, %c0_i32_0 : i32, i32
  }
  func.func @transform_2(%arg0: i32) -> (i32, i32) {
    %c0_i32 = arith.constant 0 : i32
    %c0_i32_0 = arith.constant 0 : i32
    %c0_i32_1 = arith.constant 0 : i32
    return %c0_i32, %c0_i32_0 : i32, i32
  }
  func.func @transform_3(%arg0: i32) -> (i32, i32, i32, i32) {
    %c0_i32 = arith.constant 0 : i32
    %c0_i32_0 = arith.constant 0 : i32
    %c0_i32_1 = arith.constant 0 : i32
    %c0_i32_2 = arith.constant 0 : i32
    return %arg0, %c0_i32, %c0_i32_0, %c0_i32_1 : i32, i32, i32, i32
  }
  func.func @transform_4(%arg0: i32) -> (i32, i32, i32) {
    %c0_i32 = arith.constant 0 : i32
    %c0_i32_0 = arith.constant 0 : i32
    %c0_i32_1 = arith.constant 0 : i32
    return %arg0, %c0_i32, %c0_i32_0 : i32, i32, i32
  }
}

</mosaic_0001>

<bundles_post_ra>
// kernel: tpu_custom_call.1
= control target key start
LH: loop header
LB: loop body
LE: loop exit
PB: predicated region body
PF: predicated region fallthrough
CT: control target
= control target key end

     0   :  { %10 = vsyncpa [#allocation3], 0  ;;  %s1457_s0 = inlined_call_operand.vmem [shape: f32[2,16,16,8], index: 0, kind: input, shape index: {}]   ;;  %s1458_s1 = inlined_call_operand.vmem [shape: f32[8,4], index: 1, kind: input, shape index: {}]   ;;  %s1459_s2 = inlined_call_operand.vmem [shape: f32[1,4], index: 2, kind: input, shape index: {}]   ;;  %s1460_s3 = inlined_call_operand.vmem [shape: f32[2,16,16,4], index: 3, kind: output, shape index: {0}]   ;;  %s1461_s4 = inlined_call_operand.hbm [shape: f32[2,2,4], index: 4, kind: output, shape index: {1}]  }
   0x1   :  { %12 = vsyncpa [#allocation3 + $0x1], 0  ;;  %s982_s15 = smov 0   ;;  %s984_s16 = smov 0  }
   0x2   :  { %s986_s17 = smov 0   ;;  %s988_s18 = smov 0  }
   0x3 LB: > { %s1003_s19 = sadd.s32 4294967295, %s955_s18   ;;  %s803_s20 = sadd.s32 4294967294, %s955_s18   ;;  %s955_s18 = sphi %s988_s18, %s1467_s18   ;;  %s951_s17 = sphi %s986_s17, %s1466_s17   ;;  %s947_s16 = sphi %s984_s16, %s1465_s16   ;;  %s943_s15 = sphi %s982_s15, %s1464_s15  }
   0x4   : > { %s1007_s21 = sadd.s32 1, %s955_s18   ;;  %s119_s22 = sadd.s32 1, %s951_s17 }
   0x5   : > { %s116_s23 = ssub.s32 %s955_s18, %s1007_s21  ;;  %p129_p0 = scmp.ne.s32.totalorder %s951_s17, %s947_s16 }
   0x6   : > { %p117_p1 = scmp.eq.s32.totalorder %s116_s23, 0  ;;  %p130_p2 = scmp.eq.s32.totalorder %s1003_s19, 1 }
   0x7   : > { %p135_p3 = scmp.ne.s32.totalorder %s947_s16, %s943_s15  ;;  %p136_p4 = scmp.eq.s32.totalorder %s803_s20, 1 }
   0x8   : > { %s1018_s24 = scalar_select %p117_p1, %s951_s17, %s119_s22  }
   0x9   : > { %p1020_p5 = por %p130_p2, %p129_p0  ;;  %p1024_p6 = por %p136_p4, %p135_p3 }
   0xa   : > { %p806_p7 = scmp.ge.s32.totalorder %s955_s18, 1  ;;  %p168_p8 = scmp.lt.s32.totalorder %s955_s18, 3 }
   0xc   : > { %p169_p9 = pnand %p806_p7, %p168_p8 }
   0xd   : > { %p199_p10 = scmp.lt.s32.totalorder (!%p169_p9), %s1003_s19, 1  ;;  %s196_s13 = sand.u32 (!%p169_p9), 1, %s947_s16  }
   0xe   : > { %172 = sbr.rel (%p169_p9) target bundleno = 279 (0x117), region = 32  ;;  %s807_s14 = sshll.u32 (!%p169_p9), %s196_s13, 1 }
   0xf   : > { %s845_s20 = sshll.u32 (!%p169_p9), %s1003_s19, 1  ;;  %s198_s28 = scalar_lea.vmem (!%p169_p9), [#allocation2], %s807_s14 }
  0x10   : > { %s714_s27 = scalar_lea.hbm (!%p169_p9), %s1461_s4, %s845_s20  ;;  %s913_s9 = scalar_lea.hbm (!%p169_p9), %s1461_s4, 4 }
  0x13   : > { %v273_v0 = vld [vmem:[%s1458_s1] sm:$0xff]  ;;  %s1035_s29 = scalar_select %p199_p10, %s1003_s19, 1  ;;  %vm278_vm0 = vcmask 64512   ;;  %vm488_vm1 = vcmask 31744   ;;  %vm691_vm2 = vcmask 1040384   ;;  %vm693_vm3 = vcmask 25600  }
  0x14   : > { %390 = vmatpush.msra.mxu0 %v273_v0  ;;  %850 = vmatpush.msra.mxu1 %v273_v0  ;;  %s701_s19 = scalar_lea.sflag [#allocation3], %s196_s13 }
  0x15   : > { %851 = vmatpush.msra.mxu2 %v273_v0  ;;  %852 = vmatpush.msra.mxu3 %v273_v0  ;;  %s848_s30 = sshll.u32 %s1035_s29, 8  ;;  %s716_s29 = sshll.u32 %s198_s28, 4  ;;  %s717_s29 = int_to_ptr.vmem [resolvable:$true] %s716_s29 }
  0x16   : > { %s1043_s7 = scalar_lea.vmem %s1457_s0, %s848_s30  ;;  %s1119_s12 = scalar_lea.vmem %s1460_s3, %s848_s30 }
  0x17   : > { %v209_v1 = vld [vmem:[%s1043_s7] sm:$0xff]  ;;  %v210_v7 = vld [vmem:[%s1043_s7 + $0x8] sm:$0xff]  ;;  %v211_v15 = vld [vmem:[%s1043_s7 + $0x10] sm:$0xff]  ;;  %s718_s30 = sshll.u32 %s714_s27, 4  ;;  %s719_s30 = int_to_ptr.hbm [resolvable:$true] %s718_s30 }
  0x18   : > { %v241_v2 = vmax.f32 %v209_v1, 0.0  ;;  %v217_v3 = vld [vmem:[%s1043_s7 + $0x40] sm:$0xff]  ;;  %v218_v8 = vld [vmem:[%s1043_s7 + $0x48] sm:$0xff]  ;;  %v242_v10 = vmax.f32 %v210_v7, 0.0  ;;  %v219_v16 = vld [vmem:[%s1043_s7 + $0x50] sm:$0xff]  ;;  %v243_v18 = vmax.f32 %v211_v15, 0.0 }
  0x19   : > { %v249_v4 = vmax.f32 %v217_v3, 0.0  ;;  %v225_v5 = vld [vmem:[%s1043_s7 + $0x80] sm:$0xff]  ;;  %v226_v9 = vld [vmem:[%s1043_s7 + $0x88] sm:$0xff]  ;;  %v250_v11 = vmax.f32 %v218_v8, 0.0  ;;  %v227_v17 = vld [vmem:[%s1043_s7 + $0x90] sm:$0xff]  ;;  %v251_v19 = vmax.f32 %v219_v16, 0.0 }
  0x1a   : > { %812 = vmatmul.msk.f32.vlgmr.msra.gmra.mxu0 %vm278_vm0, %v241_v2  ;;  %v257_v6 = vmax.f32 %v225_v5, 0.0  ;;  %v258_v12 = vmax.f32 %v226_v9, 0.0  ;;  %v233_v13 = vld [vmem:[%s1043_s7 + $0xc0] sm:$0xff]  ;;  %v259_v20 = vmax.f32 %v227_v17, 0.0  ;;  %v234_v21 = vld [vmem:[%s1043_s7 + $0xc8] sm:$0xff]  ;;  %v212_v23 = vld [vmem:[%s1043_s7 + $0x18] sm:$0xff] }
  0x1b   : > { %820 = vmatmul.msk.f32.vlgmr.msra.gmra.mxu1 %vm278_vm0, %v249_v4  ;;  %v265_v14 = vmax.f32 %v233_v13, 0.0  ;;  %v266_v22 = vmax.f32 %v234_v21, 0.0  ;;  %v220_v24 = vld [vmem:[%s1043_s7 + $0x58] sm:$0xff]  ;;  %v244_v26 = vmax.f32 %v212_v23, 0.0  ;;  %v235_v29 = vld [vmem:[%s1043_s7 + $0xd0] sm:$0xff]  ;;  %v213_v31 = vld [vmem:[%s1043_s7 + $0x20] sm:$0xff] }
  0x1c   : > { %828 = vmatmul.msk.f32.vlgmr.msra.gmra.mxu2 %vm278_vm0, %v257_v6  ;;  %v228_v25 = vld [vmem:[%s1043_s7 + $0x98] sm:$0xff]  ;;  %v252_v27 = vmax.f32 %v220_v24, 0.0  ;;  %v267_v30 = vmax.f32 %v235_v29, 0.0  ;;  %v221_v32 = vld [vmem:[%s1043_s7 + $0x60] sm:$0xff]  ;;  %v245_v35 = vmax.f32 %v213_v31, 0.0  ;;  %v214_v39 = vld [vmem:[%s1043_s7 + $0x28] sm:$0xff] }
  0x1d   : > { %836 = vmatmul.msk.f32.vlgmr.msra.gmra.mxu3 %vm278_vm0, %v265_v14  ;;  %v260_v28 = vmax.f32 %v228_v25, 0.0  ;;  %v229_v33 = vld [vmem:[%s1043_s7 + $0xa0] sm:$0xff]  ;;  %v236_v34 = vld [vmem:[%s1043_s7 + $0xd8] sm:$0xff]  ;;  %v253_v36 = vmax.f32 %v221_v32, 0.0  ;;  %v222_v40 = vld [vmem:[%s1043_s7 + $0x68] sm:$0xff]  ;;  %v246_v43 = vmax.f32 %v214_v39, 0.0 }
  0x1e   : > { %v261_v37 = vmax.f32 %v229_v33, 0.0  ;;  %v268_v38 = vmax.f32 %v236_v34, 0.0  ;;  %v230_v41 = vld [vmem:[%s1043_s7 + $0xa8] sm:$0xff]  ;;  %v237_v42 = vld [vmem:[%s1043_s7 + $0xe0] sm:$0xff]  ;;  %v254_v44 = vmax.f32 %v222_v40, 0.0  ;;  %v215_v47 = vld [vmem:[%s1043_s7 + $0x30] sm:$0xff] }
  0x1f   : > { %v262_v45 = vmax.f32 %v230_v41, 0.0  ;;  %v269_v46 = vmax.f32 %v237_v42, 0.0  ;;  %v223_v48 = vld [vmem:[%s1043_s7 + $0x70] sm:$0xff]  ;;  %v238_v50 = vld [vmem:[%s1043_s7 + $0xe8] sm:$0xff]  ;;  %v247_v51 = vmax.f32 %v215_v47, 0.0  ;;  %v216_v55 = vld [vmem:[%s1043_s7 + $0x38] sm:$0xff] }
  0x20   : > { %v231_v49 = vld [vmem:[%s1043_s7 + $0xb0] sm:$0xff]  ;;  %v255_v52 = vmax.f32 %v223_v48, 0.0  ;;  %v270_v54 = vmax.f32 %v238_v50, 0.0  ;;  %v224_v56 = vld [vmem:[%s1043_s7 + $0x78] sm:$0xff]  ;;  %v248_v59 = vmax.f32 %v216_v55, 0.0  ;;  %s907_s5 = sshra.s32 %s719_s30, 4  ;;  %s908_s5 = int_to_ptr.hbm [resolvable:$true] %s907_s5 }
  0x21   : > { %v263_v53 = vmax.f32 %v231_v49, 0.0  ;;  %v232_v57 = vld [vmem:[%s1043_s7 + $0xb8] sm:$0xff]  ;;  %v239_v58 = vld [vmem:[%s1043_s7 + $0xf0] sm:$0xff]  ;;  %v256_v60 = vmax.f32 %v224_v56, 0.0  ;;  %v1112_v1 = vld [vmem:[%s1459_s2] ss:$0 sm:$0xff]  ;;  %p914_p0 = scmp.lt.s32.totalorder %s908_s5, %s1461_s4 }
  0x22   : > { %813 = vmatmul.msk.f32.gmra.mxu0 %vm278_vm0, %v242_v10  ;;  %v264_v61 = vmax.f32 %v232_v57, 0.0  ;;  %v271_v62 = vmax.f32 %v239_v58, 0.0  ;;  %v240_v63 = vld [vmem:[%s1043_s7 + $0xf8] sm:$0xff]  ;;  %s909_s6 = scalar_lea.hbm %s908_s5, 2 }
  0x23   : > { %821 = vmatmul.msk.f32.gmra.mxu1 %vm278_vm0, %v250_v11  ;;  %v272_v0 = vmax.f32 %v240_v63, 0.0  ;;  %p910_p11 = scmp.ne.s32.totalorder %s908_s5, %s909_s6  ;;  %p915_p1 = scmp.lt.s32.totalorder %s913_s9, %s909_s6 }
  0x24   : > { %829 = vmatmul.msk.f32.gmra.mxu2 %vm278_vm0, %v258_v12 }
  0x25   : > { %837 = vmatmul.msk.f32.gmra.mxu3 %vm278_vm0, %v266_v22  ;;  %p911_p12 = pnand %p910_p11, %p1020_p5  ;;  %p916_p2 = por %p915_p1, %p914_p0 }
  0x27   : > { %p912_p13 = pneg %p911_p12 }
  0x29   : > { %p917_p3 = pnand %p916_p2, %p912_p13 }
  0x2a   : > { %814 = vmatmul.msk.f32.gmra.mxu0 %vm278_vm0, %v243_v18 }
  0x2b   : > { %822 = vmatmul.msk.f32.gmra.mxu1 %vm278_vm0, %v251_v19 }
  0x2c   : > { %830 = vmatmul.msk.f32.gmra.mxu2 %vm278_vm0, %v259_v20 }
  0x2d   : > { %838 = vmatmul.msk.f32.gmra.mxu3 %vm278_vm0, %v267_v30 }
  0x32   : > { %815 = vmatmul.msk.f32.gmra.mxu0 %vm278_vm0, %v244_v26 }
  0x33   : > { %823 = vmatmul.msk.f32.gmra.mxu1 %vm278_vm0, %v252_v27 }
  0x34   : > { %831 = vmatmul.msk.f32.gmra.mxu2 %vm278_vm0, %v260_v28 }
  0x35   : > { %839 = vmatmul.msk.f32.gmra.mxu3 %vm278_vm0, %v268_v38 }
  0x3a   : > { %816 = vmatmul.msk.f32.gmra.mxu0 %vm278_vm0, %v245_v35 }
  0x3b   : > { %824 = vmatmul.msk.f32.gmra.mxu1 %vm278_vm0, %v253_v36 }
  0x3c   : > { %832 = vmatmul.msk.f32.gmra.mxu2 %vm278_vm0, %v261_v37 }
  0x3d   : > { %840 = vmatmul.msk.f32.gmra.mxu3 %vm278_vm0, %v269_v46 }
  0x42   : > { %817 = vmatmul.msk.f32.gmra.mxu0 %vm278_vm0, %v246_v43 }
  0x43   : > { %825 = vmatmul.msk.f32.gmra.mxu1 %vm278_vm0, %v254_v44 }
  0x44   : > { %833 = vmatmul.msk.f32.gmra.mxu2 %vm278_vm0, %v262_v45 }
  0x45   : > { %841 = vmatmul.msk.f32.gmra.mxu3 %vm278_vm0, %v270_v54 }
  0x4a   : > { %818 = vmatmul.msk.f32.gmra.mxu0 %vm278_vm0, %v247_v51 }
  0x4b   : > { %826 = vmatmul.msk.f32.gmra.mxu1 %vm278_vm0, %v255_v52 }
  0x4c   : > { %834 = vmatmul.msk.f32.gmra.mxu2 %vm278_vm0, %v263_v53 }
  0x4d   : > { %842 = vmatmul.msk.f32.gmra.mxu3 %vm278_vm0, %v271_v62 }
  0x52   : > { %819 = vmatmul.msk.f32.gmra.mxu0 %vm278_vm0, %v248_v59 }
  0x53   : > { %827 = vmatmul.msk.f32.gmra.mxu1 %vm278_vm0, %v256_v60 }
  0x54   : > { %835 = vmatmul.msk.f32.gmra.mxu2 %vm278_vm0, %v264_v61 }
  0x55   : > { %843 = vmatmul.msk.f32.gmra.mxu3 %vm278_vm0, %v272_v0 }
  0x97   : > { %v392_v2 = vpop.f32.mrf.mxu0 }
  0x98   : > { %v1122_v3 = vadd.f32 %v1112_v1, %v392_v2  ;;  %v416_v4 = vpop.f32.mrf.mxu1 }
  0x99   : > { %v1125_v5 = vadd.f32 %v1112_v1, %v416_v4 }
  0x9a   : > { %489 = vst.msk [vmem:[%s1119_s12] sm:$0xff] %vm488_vm1, %v1122_v3  ;;  %v590_v45 = vmul.f32 %v1122_v3, %v1122_v3  ;;  %v521_v48 = vsel %vm488_vm1, %v1122_v3, 0.0 }
  0x9b   : > { %497 = vst.msk [vmem:[%s1119_s12 + $0x40] sm:$0xff] %vm488_vm1, %v1125_v5 }
  0x9c   : > { %v622_v52 = vsel %vm488_vm1, %v590_v45, 0.0 }
  0x9f   : > { %v395_v6 = vpop.f32.mrf.mxu0  ;;  %v440_v7 = vpop.f32.mrf.mxu2 }
  0xa0   : > { %v396_v8 = vadd.f32 %v1112_v1, %v395_v6  ;;  %v419_v9 = vpop.f32.mrf.mxu1  ;;  %v1135_v10 = vadd.f32 %v1112_v1, %v440_v7  ;;  %v464_v17 = vpop.f32.mrf.mxu3 }
  0xa1   : > { %v1138_v11 = vadd.f32 %v1112_v1, %v419_v9  ;;  %v1156_v19 = vadd.f32 %v1112_v1, %v464_v17 }
  0xa2   : > { %490 = vst.msk [vmem:[%s1119_s12 + $0x8] sm:$0xff] %vm488_vm1, %v396_v8  ;;  %v591_v44 = vmul.f32 %v396_v8, %v396_v8  ;;  %v522_v47 = vsel %vm488_vm1, %v396_v8, 0.0 }
  0xa3   : > { %498 = vst.msk [vmem:[%s1119_s12 + $0x48] sm:$0xff] %vm488_vm1, %v1138_v11  ;;  %v523_v53 = vadd.f32 %v522_v47, %v521_v48 }
  0xa4   : > { %505 = vst.msk [vmem:[%s1119_s12 + $0x80] sm:$0xff] %vm488_vm1, %v1135_v10  ;;  %v623_v49 = vsel %vm488_vm1, %v591_v44, 0.0  ;;  %v598_v44 = vmul.f32 %v1125_v5, %v1125_v5 }
  0xa5   : > { %513 = vst.msk [vmem:[%s1119_s12 + $0xc0] sm:$0xff] %vm488_vm1, %v1156_v19  ;;  %v624_v63 = vadd.f32 %v623_v49, %v622_v52  ;;  %v536_v49 = vsel %vm488_vm1, %v1125_v5, 0.0 }
  0xa7   : > { %v398_v12 = vpop.f32.mrf.mxu0  ;;  %v443_v13 = vpop.f32.mrf.mxu2 }
  0xa8   : > { %v399_v14 = vadd.f32 %v1112_v1, %v398_v12  ;;  %v422_v15 = vpop.f32.mrf.mxu1  ;;  %v1150_v16 = vadd.f32 %v1112_v1, %v443_v13  ;;  %v467_v25 = vpop.f32.mrf.mxu3 }
  0xa9   : > { %v1153_v18 = vadd.f32 %v1112_v1, %v422_v15  ;;  %v1177_v27 = vadd.f32 %v1112_v1, %v467_v25 }
  0xaa   : > { %491 = vst.msk [vmem:[%s1119_s12 + $0x10] sm:$0xff] %vm488_vm1, %v399_v14  ;;  %v592_v46 = vmul.f32 %v399_v14, %v399_v14  ;;  %v524_v50 = vsel %vm488_vm1, %v399_v14, 0.0 }
  0xab   : > { %499 = vst.msk [vmem:[%s1119_s12 + $0x50] sm:$0xff] %vm488_vm1, %v1153_v18  ;;  %v525_v0 = vadd.f32 %v524_v50, %v523_v53  ;;  %v599_v50 = vmul.f32 %v1138_v11, %v1138_v11  ;;  %v600_v5 = vmul.f32 %v1153_v18, %v1153_v18 }
  0xac   : > { %506 = vst.msk [vmem:[%s1119_s12 + $0x88] sm:$0xff] %vm488_vm1, %v1150_v16  ;;  %v625_v54 = vsel %vm488_vm1, %v592_v46, 0.0 }
  0xad   : > { %514 = vst.msk [vmem:[%s1119_s12 + $0xc8] sm:$0xff] %vm488_vm1, %v1177_v27  ;;  %v626_v8 = vadd.f32 %v625_v54, %v624_v63  ;;  %v637_v54 = vsel %vm488_vm1, %v598_v44, 0.0 }
  0xaf   : > { %v401_v20 = vpop.f32.mrf.mxu0  ;;  %v446_v21 = vpop.f32.mrf.mxu2 }
  0xb0   : > { %v402_v22 = vadd.f32 %v1112_v1, %v401_v20  ;;  %v425_v23 = vpop.f32.mrf.mxu1  ;;  %v1171_v24 = vadd.f32 %v1112_v1, %v446_v21  ;;  %v470_v33 = vpop.f32.mrf.mxu3 }
  0xb1   : > { %v1174_v26 = vadd.f32 %v1112_v1, %v425_v23  ;;  %v1198_v35 = vadd.f32 %v1112_v1, %v470_v33 }
  0xb2   : > { %492 = vst.msk [vmem:[%s1119_s12 + $0x18] sm:$0xff] %vm488_vm1, %v402_v22  ;;  %v593_v51 = vmul.f32 %v402_v22, %v402_v22  ;;  %v526_v57 = vsel %vm488_vm1, %v402_v22, 0.0 }
  0xb3   : > { %500 = vst.msk [vmem:[%s1119_s12 + $0x58] sm:$0xff] %vm488_vm1, %v1174_v26  ;;  %v527_v9 = vadd.f32 %v526_v57, %v525_v0 }
  0xb4   : > { %507 = vst.msk [vmem:[%s1119_s12 + $0x90] sm:$0xff] %vm488_vm1, %v1171_v24  ;;  %v627_v4 = vsel %vm488_vm1, %v593_v51, 0.0 }
  0xb5   : > { %515 = vst.msk [vmem:[%s1119_s12 + $0xd0] sm:$0xff] %vm488_vm1, %v1198_v35  ;;  %v628_v15 = vadd.f32 %v627_v4, %v626_v8  ;;  %v542_v8 = vsel %vm488_vm1, %v1174_v26, 0.0 }
  0xb7   : > { %v404_v28 = vpop.f32.mrf.mxu0  ;;  %v449_v29 = vpop.f32.mrf.mxu2 }
  0xb8   : > { %v405_v30 = vadd.f32 %v1112_v1, %v404_v28  ;;  %v428_v31 = vpop.f32.mrf.mxu1  ;;  %v1192_v32 = vadd.f32 %v1112_v1, %v449_v29  ;;  %v473_v41 = vpop.f32.mrf.mxu3 }
  0xb9   : > { %v1195_v34 = vadd.f32 %v1112_v1, %v428_v31  ;;  %v1219_v43 = vadd.f32 %v1112_v1, %v473_v41 }
  0xba   : > { %493 = vst.msk [vmem:[%s1119_s12 + $0x20] sm:$0xff] %vm488_vm1, %v405_v30  ;;  %v594_v58 = vmul.f32 %v405_v30, %v405_v30  ;;  %v528_v6 = vsel %vm488_vm1, %v405_v30, 0.0 }
  0xbb   : > { %501 = vst.msk [vmem:[%s1119_s12 + $0x60] sm:$0xff] %vm488_vm1, %v1195_v34  ;;  %v529_v17 = vadd.f32 %v528_v6, %v527_v9 }
  0xbc   : > { %508 = vst.msk [vmem:[%s1119_s12 + $0x98] sm:$0xff] %vm488_vm1, %v1192_v32  ;;  %v629_v12 = vsel %vm488_vm1, %v594_v58, 0.0 }
  0xbd   : > { %516 = vst.msk [vmem:[%s1119_s12 + $0xd8] sm:$0xff] %vm488_vm1, %v1219_v43  ;;  %v630_v22 = vadd.f32 %v629_v12, %v628_v15 }
  0xbf   : > { %v407_v36 = vpop.f32.mrf.mxu0  ;;  %v452_v37 = vpop.f32.mrf.mxu2 }
  0xc0   : > { %v408_v38 = vadd.f32 %v1112_v1, %v407_v36  ;;  %v431_v39 = vpop.f32.mrf.mxu1  ;;  %v1213_v40 = vadd.f32 %v1112_v1, %v452_v37  ;;  %v476_v62 = vpop.f32.mrf.mxu3 }
  0xc1   : > { %v1216_v42 = vadd.f32 %v1112_v1, %v431_v39  ;;  %v1250_v3 = vadd.f32 %v1112_v1, %v476_v62  ;;  %v601_v62 = vmul.f32 %v1174_v26, %v1174_v26 }
  0xc2   : > { %494 = vst.msk [vmem:[%s1119_s12 + $0x28] sm:$0xff] %vm488_vm1, %v408_v38  ;;  %v595_v7 = vmul.f32 %v408_v38, %v408_v38  ;;  %v530_v13 = vsel %vm488_vm1, %v408_v38, 0.0 }
  0xc3   : > { %502 = vst.msk [vmem:[%s1119_s12 + $0x68] sm:$0xff] %vm488_vm1, %v1216_v42  ;;  %v531_v23 = vadd.f32 %v530_v13, %v529_v17  ;;  %v643_v13 = vsel %vm488_vm1, %v601_v62, 0.0  ;;  %v603_v15 = vmul.f32 %v1216_v42, %v1216_v42 }
  0xc4   : > { %509 = vst.msk [vmem:[%s1119_s12 + $0xa0] sm:$0xff] %vm488_vm1, %v1213_v40  ;;  %v631_v20 = vsel %vm488_vm1, %v595_v7, 0.0  ;;  %v641_v7 = vsel %vm488_vm1, %v600_v5, 0.0 }
  0xc5   : > { %517 = vst.msk [vmem:[%s1119_s12 + $0xe0] sm:$0xff] %vm488_vm1, %v1250_v3  ;;  %v632_v37 = vadd.f32 %v631_v20, %v630_v22 }
  0xc7   : > { %v410_v55 = vpop.f32.mrf.mxu0  ;;  %v455_v56 = vpop.f32.mrf.mxu2 }
  0xc8   : > { %v411_v59 = vadd.f32 %v1112_v1, %v410_v55  ;;  %v434_v60 = vpop.f32.mrf.mxu1  ;;  %v1244_v61 = vadd.f32 %v1112_v1, %v455_v56  ;;  %v479_v36 = vpop.f32.mrf.mxu3  ;;  %v538_v55 = vsel %vm488_vm1, %v1138_v11, 0.0 }
  0xc9   : > { %v1247_v2 = vadd.f32 %v1112_v1, %v434_v60  ;;  %v1276_v41 = vadd.f32 %v1112_v1, %v479_v36  ;;  %v540_v60 = vsel %vm488_vm1, %v1153_v18, 0.0  ;;  %v602_v18 = vmul.f32 %v1195_v34, %v1195_v34 }
  0xca   : > { %495 = vst.msk [vmem:[%s1119_s12 + $0x30] sm:$0xff] %vm488_vm1, %v411_v59  ;;  %v596_v14 = vmul.f32 %v411_v59, %v411_v59  ;;  %v532_v21 = vsel %vm488_vm1, %v411_v59, 0.0  ;;  %v639_v59 = vsel %vm488_vm1, %v599_v50, 0.0  ;;  %v554_v50 = vsel %vm488_vm1, %v1150_v16, 0.0 }
  0xcb   : > { %503 = vst.msk [vmem:[%s1119_s12 + $0x70] sm:$0xff] %vm488_vm1, %v1247_v2  ;;  %v533_v38 = vadd.f32 %v532_v21, %v531_v23  ;;  %v645_v20 = vsel %vm488_vm1, %v602_v18, 0.0  ;;  %v546_v21 = vsel %vm488_vm1, %v1216_v42, 0.0  ;;  %v604_v22 = vmul.f32 %v1247_v2, %v1247_v2 }
  0xcc   : > { %510 = vst.msk [vmem:[%s1119_s12 + $0xa8] sm:$0xff] %vm488_vm1, %v1244_v61  ;;  %v633_v29 = vsel %vm488_vm1, %v596_v14, 0.0  ;;  %v544_v14 = vsel %vm488_vm1, %v1195_v34, 0.0  ;;  %v548_v34 = vsel %vm488_vm1, %v1247_v2, 0.0  ;;  %v606_v42 = vmul.f32 %v1135_v10, %v1135_v10 }
  0xcd   : > { %v634_v47 = vadd.f32 %v633_v29, %v632_v37  ;;  %518 = vst.msk [vmem:[%s1119_s12 + $0xe8] sm:$0xff] %vm488_vm1, %v1276_v41  ;;  %v647_v29 = vsel %vm488_vm1, %v603_v15, 0.0  ;;  %v649_v44 = vsel %vm488_vm1, %v604_v22, 0.0  ;;  %v552_v2 = vsel %vm488_vm1, %v1135_v10, 0.0 }
  0xce   : > { %v556_v10 = vsel %vm488_vm1, %v1171_v24, 0.0 }
  0xcf   : > { %v413_v25 = vpop.f32.mrf.mxu0  ;;  %v458_v28 = vpop.f32.mrf.mxu2 }
  0xd0   : > { %v414_v30 = vadd.f32 %v1112_v1, %v413_v25  ;;  %v437_v31 = vpop.f32.mrf.mxu1  ;;  %v1272_v33 = vadd.f32 %v1112_v1, %v458_v28  ;;  %v482_v11 = vpop.f32.mrf.mxu3 }
  0xd1   : > { %v438_v39 = vadd.f32 %v1112_v1, %v437_v31  ;;  %v1310_v6 = vadd.f32 %v1112_v1, %v482_v11  ;;  %v611_v11 = vmul.f32 %v1244_v61, %v1244_v61 }
  0xd2   : > { %496 = vst.msk [vmem:[%s1119_s12 + $0x38] sm:$0xff] %vm488_vm1, %v414_v30  ;;  %v534_v45 = vsel %vm488_vm1, %v414_v30, 0.0  ;;  %v597_v46 = vmul.f32 %v414_v30, %v414_v30 }
  0xd3   : > { %v535_v48 = vadd.f32 %v534_v45, %v533_v38  ;;  %504 = vst.msk [vmem:[%s1119_s12 + $0x78] sm:$0xff] %vm488_vm1, %v438_v39  ;;  %v605_v23 = vmul.f32 %v438_v39, %v438_v39  ;;  %v550_v30 = vsel %vm488_vm1, %v438_v39, 0.0  ;;  %v607_v39 = vmul.f32 %v1150_v16, %v1150_v16 }
  0xd4   : > { %v635_v51 = vsel %vm488_vm1, %v597_v46, 0.0  ;;  %511 = vst.msk [vmem:[%s1119_s12 + $0xb0] sm:$0xff] %vm488_vm1, %v1272_v33  ;;  %v558_v16 = vsel %vm488_vm1, %v1192_v32, 0.0 }
  0xd5   : > { %v537_v52 = vadd.f32 %v536_v49, %v535_v48  ;;  %v636_v53 = vadd.f32 %v635_v51, %v634_v47  ;;  %519 = vst.msk [vmem:[%s1119_s12 + $0xf0] sm:$0xff] %vm488_vm1, %v1310_v6  ;;  %v651_v45 = vsel %vm488_vm1, %v605_v23, 0.0  ;;  %v653_v49 = vsel %vm488_vm1, %v606_v42, 0.0 }
  0xd6   : > { %v608_v51 = vmul.f32 %v1171_v24, %v1171_v24  ;;  %v560_v24 = vsel %vm488_vm1, %v1213_v40, 0.0  ;;  %v568_v23 = vsel %vm488_vm1, %v1156_v19, 0.0 }
  0xd7   : > { %v539_v56 = vadd.f32 %v538_v55, %v537_v52  ;;  %v638_v57 = vadd.f32 %v637_v54, %v636_v53  ;;  %v461_v58 = vpop.f32.mrf.mxu2  ;;  %v655_v54 = vsel %vm488_vm1, %v607_v39, 0.0  ;;  %v609_v55 = vmul.f32 %v1192_v32, %v1192_v32 }
  0xd8   : > { %v1307_v63 = vadd.f32 %v1112_v1, %v461_v58  ;;  %v485_v31 = vpop.f32.mrf.mxu3  ;;  %v610_v58 = vmul.f32 %v1213_v40, %v1213_v40  ;;  %v562_v32 = vsel %vm488_vm1, %v1244_v61, 0.0  ;;  %v663_v40 = vsel %vm488_vm1, %v611_v11, 0.0 }
  0xd9   : > { %v640_v0 = vadd.f32 %v639_v59, %v638_v57  ;;  %v541_v4 = vadd.f32 %v540_v60, %v539_v56  ;;  %v1338_v38 = vadd.f32 %v1112_v1, %v485_v31  ;;  %v657_v57 = vsel %vm488_vm1, %v608_v51, 0.0 }
  0xda   : > { %512 = vst.msk [vmem:[%s1119_s12 + $0xb8] sm:$0xff] %vm488_vm1, %v1307_v63  ;;  %v659_v62 = vsel %vm488_vm1, %v609_v55, 0.0  ;;  %v613_v18 = vmul.f32 %v1307_v63, %v1307_v63  ;;  %v614_v61 = vmul.f32 %v1156_v19, %v1156_v19  ;;  %v572_v19 = vsel %vm488_vm1, %v1198_v35, 0.0 }
  0xdb   : > { %v543_v9 = vadd.f32 %v542_v8, %v541_v4  ;;  %v642_v12 = vadd.f32 %v641_v7, %v640_v0  ;;  %520 = vst.msk [vmem:[%s1119_s12 + $0xf8] sm:$0xff] %vm488_vm1, %v1338_v38  ;;  %v661_v7 = vsel %vm488_vm1, %v610_v58, 0.0  ;;  %v612_v8 = vmul.f32 %v1272_v33, %v1272_v33 }
  0xdc   : > { %v620_v51 = vmul.f32 %v1310_v6, %v1310_v6  ;;  %v582_v55 = vsel %vm488_vm1, %v1338_v38, 0.0 }
  0xdd   : > { %v545_v26 = vadd.f32 %v544_v14, %v543_v9  ;;  %v644_v17 = vadd.f32 %v643_v13, %v642_v12  ;;  %v564_v13 = vsel %vm488_vm1, %v1272_v33, 0.0  ;;  %v566_v14 = vsel %vm488_vm1, %v1307_v63, 0.0 }
  0xde   : > { %v615_v33 = vmul.f32 %v1177_v27, %v1177_v27  ;;  %v669_v63 = vsel %vm488_vm1, %v614_v61, 0.0 }
  0xdf   : > { %v547_v25 = vadd.f32 %v546_v21, %v545_v26  ;;  %v646_v28 = vadd.f32 %v645_v20, %v644_v17  ;;  %v665_v17 = vsel %vm488_vm1, %v612_v8, 0.0  ;;  %v667_v20 = vsel %vm488_vm1, %v613_v18, 0.0 }
  0xe1   : > { %v648_v36 = vadd.f32 %v647_v29, %v646_v28  ;;  %v549_v37 = vadd.f32 %v548_v34, %v547_v25  ;;  %v570_v29 = vsel %vm488_vm1, %v1177_v27, 0.0  ;;  %v616_v34 = vmul.f32 %v1198_v35, %v1198_v35 }
  0xe2   : > { %v574_v27 = vsel %vm488_vm1, %v1219_v43, 0.0  ;;  %v576_v35 = vsel %vm488_vm1, %v1250_v3, 0.0 }
  0xe3   : > { %v650_v46 = vadd.f32 %v649_v44, %v648_v36  ;;  %v551_v47 = vadd.f32 %v550_v30, %v549_v37  ;;  %v671_v36 = vsel %vm488_vm1, %v615_v33, 0.0  ;;  %v617_v37 = vmul.f32 %v1219_v43, %v1219_v43 }
  0xe4   : > { %v578_v43 = vsel %vm488_vm1, %v1276_v41, 0.0 }
  0xe5   : > { %v553_v1 = vadd.f32 %v552_v2, %v551_v47  ;;  %v652_v48 = vadd.f32 %v651_v45, %v650_v46  ;;  %v673_v45 = vsel %vm488_vm1, %v616_v34, 0.0  ;;  %v618_v46 = vmul.f32 %v1250_v3, %v1250_v3 }
  0xe6   : > { %v675_v39 = vsel %vm488_vm1, %v617_v37, 0.0 }
  0xe7   : > { %v555_v52 = vadd.f32 %v554_v50, %v553_v1  ;;  %v654_v53 = vadd.f32 %v653_v49, %v652_v48  ;;  %v619_v1 = vmul.f32 %v1276_v41, %v1276_v41  ;;  %v677_v50 = vsel %vm488_vm1, %v618_v46, 0.0 }
  0xe9   : > { %v656_v5 = vadd.f32 %v655_v54, %v654_v53  ;;  %v557_v56 = vadd.f32 %v556_v10, %v555_v52  ;;  %v621_v52 = vmul.f32 %v1338_v38, %v1338_v38  ;;  %v679_v3 = vsel %vm488_vm1, %v619_v1, 0.0 }
  0xea   : > { %v580_v10 = vsel %vm488_vm1, %v1310_v6, 0.0 }
  0xeb   : > { %v559_v59 = vadd.f32 %v558_v16, %v557_v56  ;;  %v658_v60 = vadd.f32 %v657_v57, %v656_v5  ;;  %v681_v56 = vsel %vm488_vm1, %v620_v51, 0.0  ;;  %v683_v57 = vsel %vm488_vm1, %v621_v52, 0.0 }
  0xed   : > { %v561_v0 = vadd.f32 %v560_v24, %v559_v59  ;;  %v660_v4 = vadd.f32 %v659_v62, %v658_v60 }
  0xef   : > { %v563_v9 = vadd.f32 %v562_v32, %v561_v0  ;;  %v662_v12 = vadd.f32 %v661_v7, %v660_v4 }
  0xf1   : > { %v664_v15 = vadd.f32 %v663_v40, %v662_v12  ;;  %v565_v26 = vadd.f32 %v564_v13, %v563_v9 }
  0xf3   : > { %v666_v21 = vadd.f32 %v665_v17, %v664_v15  ;;  %v567_v22 = vadd.f32 %v566_v14, %v565_v26 }
  0xf5   : > { %v569_v25 = vadd.f32 %v568_v23, %v567_v22  ;;  %v668_v28 = vadd.f32 %v667_v20, %v666_v21 }
  0xf7   : > { %v571_v30 = vadd.f32 %v570_v29, %v569_v25  ;;  %v670_v31 = vadd.f32 %v669_v63, %v668_v28 }
  0xf9   : > { %v672_v42 = vadd.f32 %v671_v36, %v670_v31  ;;  %v573_v44 = vadd.f32 %v572_v19, %v571_v30 }
  0xfb   : > { %v575_v47 = vadd.f32 %v574_v27, %v573_v44  ;;  %v674_v2 = vadd.f32 %v673_v45, %v672_v42 }
  0xfd   : > { %v577_v48 = vadd.f32 %v576_v35, %v575_v47  ;;  %v676_v49 = vadd.f32 %v675_v39, %v674_v2 }
  0xff   : > { %v579_v53 = vadd.f32 %v578_v43, %v577_v48  ;;  %v678_v54 = vadd.f32 %v677_v50, %v676_v49 }
 0x101   : > { %v680_v5 = vadd.f32 %v679_v3, %v678_v54  ;;  %v581_v41 = vadd.f32 %v580_v10, %v579_v53 }
 0x103   : > { %v682_v16 = vadd.f32 %v681_v56, %v680_v5  ;;  %v583_v58 = vadd.f32 %v582_v55, %v581_v41 }
 0x105   : > { %v584_v59 = vrot.slane %v583_v58, 4  ;;  %v684_v60 = vadd.f32 %v683_v57, %v682_v16 }
 0x107   : > { %v585_v62 = vadd.f32 %v584_v59, %v583_v58  ;;  %v685_v24 = vrot.slane %v684_v60, 4 }
 0x109   : > { %v586_v11 = vrot.slane %v585_v62, 2  ;;  %v686_v0 = vadd.f32 %v685_v24, %v684_v60 }
 0x10b   : > { %v587_v6 = vadd.f32 %v586_v11, %v585_v62  ;;  %v687_v4 = vrot.slane %v686_v0, 2 }
 0x10d   : > { %v588_v38 = vrot.slane %v587_v6, 1  ;;  %v688_v7 = vadd.f32 %v687_v4, %v686_v0 }
 0x10f   : > { %v689_v32 = vrot.slane %v688_v7, 1  ;;  %v589_v8 = vadd.f32 %v588_v38, %v587_v6 }
 0x111   : > { %v690_v18 = vadd.f32 %v689_v32, %v688_v7 }
 0x113   : > { %v692_v9 = vsel %vm691_vm2, %v589_v8, %v690_v18 }
 0x114   : > { %694 = vst.msk [vmem:[%s198_s28] sm:$0x3] %vm693_vm3, %v692_v9 }
 0x115   : > { %920 = shalt.err (!%p917_p3)
}
 0x116   : > { %853 = dma.vmem_to_hbm [thread:$0]  (%p1020_p5), %s717_s29, 32, %s719_s30, %s701_s19  }
 0x117 PF: > { %p859_p4 = scmp.ge.s32.totalorder %s955_s18, 2  ;;  %s738_s12 = sand.u32 1, %s943_s15  }
 0x118   : > { %s739_s13 = scalar_lea.sflag [#allocation3], %s738_s12 }
 0x119   : > { %p856_p7 = pnand %p859_p4, %p1024_p6 }
 0x11b   : > { %p857_p8 = pneg %p856_p7 }
 0x11d   : > { %938 = dma.done.wait (%p857_p8), %s739_s13, 32  }
 0x11e   : > { %940 = vsyncadd (%p857_p8), %s739_s13, 4294967264  ;;  %p15_p9 = scmp.ge.s32.totalorder %s1007_s21, 4   ;;  %s1464_s15 = smov %s947_s16 }
 0x11f   : > { %s1465_s16 = smov %s951_s17  ;;  %s1466_s17 = smov %s1018_s24 }
 0x120   : > { %s1467_s18 = smov %s1007_s21  ;;  %17 = sbr.rel (!%p15_p9) target bundleno = 3 (0x3), region = 79 }
 0x125   :  { %745 = vsyncpa [#allocation3], 1 }
 0x126   :  { %747 = vsyncpa [#allocation3 + $0x1], 1 }

</bundles_post_ra>
